<compile_context>
chip_gen: v6e
topology: v6e:2x2x1
jax: 0.10.0
libtpu: 0.0.40
codegen_flags: <defaults>
</compile_context>

<pallas_src>
import functools

import jax
import jax.numpy as jnp
from jax.experimental import pallas as pl
from jax.experimental.pallas import tpu as pltpu


def _round_up(x: int, m: int) -> int:
    return ((x + m - 1) // m) * m


def _pick_tile(requested: int, padded: int, unit: int = 128) -> int:
    """Largest tile <= requested that divides `padded` and is a multiple of `unit`."""
    m = padded // unit
    d = max(1, min(requested // unit, m))
    while m % d != 0:
        d -= 1
    return d * unit


# ---------------------------------------------------------------------------
# Kernels
# ---------------------------------------------------------------------------
def _fused_small_kernel(x_ref, wt_ref, b_ref, o_ref):
    # Whole problem in one invocation: x:(Bp,Kp) @ wt:(Kp,Np) + b:(1,Np).
    acc = jnp.dot(x_ref[...], wt_ref[...], preferred_element_type=jnp.float32)
    o_ref[...] = jnp.maximum(acc + b_ref[...], 0.0).astype(o_ref.dtype)


def _linear_relu_kernel_f32out(x_ref, wt_ref, b_ref, o_ref):
    # f32 output: accumulate directly into the resident output tile.
    # Init with the broadcast bias at k==0; finalize is just the ReLU.
    k = pl.program_id(2)

    @pl.when(k == 0)
    def _():
        o_ref[...] = jnp.broadcast_to(b_ref[...], o_ref.shape)

    o_ref[...] += jnp.dot(
        x_ref[...], wt_ref[...], preferred_element_type=jnp.float32
    )

    @pl.when(k == pl.num_programs(2) - 1)
    def _():
        o_ref[...] = jnp.maximum(o_ref[...], 0.0)


def _linear_relu_kernel_scratch(x_ref, wt_ref, b_ref, o_ref, acc_ref):
    # Non-f32 output: keep an f32 VMEM accumulator, cast once at the end.
    k = pl.program_id(2)

    @pl.when(k == 0)
    def _():
        acc_ref[...] = jnp.broadcast_to(b_ref[...], acc_ref.shape)

    acc_ref[...] += jnp.dot(
        x_ref[...], wt_ref[...], preferred_element_type=jnp.float32
    )

    @pl.when(k == pl.num_programs(2) - 1)
    def _():
        o_ref[...] = jnp.maximum(acc_ref[...], 0.0).astype(o_ref.dtype)


# ---------------------------------------------------------------------------
# One-time weight preparation (hoisted out of the per-call hot path)
# ---------------------------------------------------------------------------
def prepare_linear_params(weight, bias, *, use_bf16=True):
    """W[d_out, d_in] -> padded W^T [Kp, Np] (optionally bf16); bias -> f32 [1, Np].

    Call once and keep the returned buffers; `simple_net_forward` only
    pads/casts x per call, so the weight is never re-read/re-written in HBM.
    """
    d_out, d_in = weight.shape
    Kp = _round_up(d_in, 128)
    Np = _round_up(d_out, 128)
    wt_p = jnp.pad(weight.T, ((0, Kp - d_in), (0, Np - d_out)))
    if use_bf16:
        wt_p = wt_p.astype(jnp.bfloat16)
    b_p = jnp.pad(bias, (0, Np - d_out)).reshape(1, Np).astype(jnp.float32)
    return jax.device_put(wt_p), jax.device_put(b_p)


# ---------------------------------------------------------------------------
# Forward
# ---------------------------------------------------------------------------
@functools.partial(
    jax.jit, static_argnames=("d_out", "tm", "tn", "tk", "small_fast_path"))
def simple_net_forward(x, wt_p, b_p, *, d_out, tm=512, tn=512, tk=512,
                       small_fast_path=True):
    """relu(x @ W.T + b) with pre-prepared (padded, transposed) weights.

    x:    [B, d_in]
    wt_p: [Kp, Np]  pre-transposed / padded / (bf16) weight from prepare_linear_params
    b_p:  [1, Np]   padded f32 bias
    """
    B, d_in = x.shape
    Kp, Np = wt_p.shape
    assert d_in <= Kp and d_out <= Np
    in_dtype = wt_p.dtype
    in_bytes = jnp.dtype(in_dtype).itemsize
    out_dtype = x.dtype

    # bf16 packs two rows per sublane -> pad batch to a multiple of 16.
    Bp16 = _round_up(B, 16)

    # ---------------- Small-problem fast path: single invocation ------------
    total_bytes = (Bp16 * Kp + Kp * Np) * in_bytes + Bp16 * Np * 4 + Np * 4
    if small_fast_path and total_bytes <= (2 << 20):
        Bp = Bp16
        x_p = jnp.pad(x, ((0, Bp - B), (0, Kp - d_in))).astype(in_dtype)
        out_p = pl.pallas_call(
            _fused_small_kernel,
            out_shape=jax.ShapeDtypeStruct((Bp, Np), out_dtype),
            grid_spec=pltpu.PrefetchScalarGridSpec(
                num_scalar_prefetch=0,
                grid=(1,),
                in_specs=[
                    pl.BlockSpec((Bp, Kp), lambda i: (0, 0)),   # x
                    pl.BlockSpec((Kp, Np), lambda i: (0, 0)),   # W^T
                    pl.BlockSpec((1, Np), lambda i: (0, 0)),    # bias
                ],
                out_specs=pl.BlockSpec((Bp, Np), lambda i: (0, 0)),
            ),
        )(x_p, wt_p, b_p)
        return out_p[:B, :d_out]

    # ---------------- Tiled 3-D grid path ------------------------------------
    tm = max(16, (min(tm, Bp16) // 16) * 16)
    Bp = _round_up(Bp16, tm)
    x_p = jnp.pad(x, ((0, Bp - B), (0, Kp - d_in))).astype(in_dtype)

    tk = _pick_tile(tk, Kp)
    tn = _pick_tile(tn, Np)
    # Megacore: expose >= 2 tiles on the parallel axes when batch has only one.
    if Bp // tm == 1 and Np // tn == 1 and Np // 128 >= 2:
        tn = _pick_tile(max(128, ((Np // 2) // 128) * 128), Np)

    grid = (Bp // tm, Np // tn, Kp // tk)

    # Explicit VMEM budget: double-buffered x/W tiles + output + slack,
    # floored at 32 MiB, capped at 48 MiB (below v7x's 64 MiB physical).
    est = 2 * (tm * tk + tk * tn) * in_bytes + 3 * tm * tn * 4 + 2 * tn * 4
    vmem_limit = int(min(max(2 * est, 32 << 20), 48 << 20))

    if out_dtype == jnp.float32:
        kernel = _linear_relu_kernel_f32out
        scratch = []                                   # accumulate in o_ref
    else:
        kernel = _linear_relu_kernel_scratch
        scratch = [pltpu.VMEM((tm, tn), jnp.float32)]  # f32 accumulator

    out_p = pl.pallas_call(
        kernel,
        out_shape=jax.ShapeDtypeStruct((Bp, Np), out_dtype),
        grid_spec=pltpu.PrefetchScalarGridSpec(
            num_scalar_prefetch=0,
            grid=grid,
            in_specs=[
                pl.BlockSpec((tm, tk), lambda i, j, k: (i, k)),   # x
                pl.BlockSpec((tk, tn), lambda i, j, k: (k, j)),   # W^T
                pl.BlockSpec((1, tn), lambda i, j, k: (0, j)),    # bias
            ],
            out_specs=pl.BlockSpec((tm, tn), lambda i, j, k: (i, j)),
            scratch_shapes=scratch,
        ),
        compiler_params=pltpu.CompilerParams(
            dimension_semantics=("parallel", "parallel", "arbitrary"),
            vmem_limit_bytes=vmem_limit,
        ),
    )(x_p, wt_p, b_p)

    return out_p[:B, :d_out]


if __name__ == "__main__":
    key = jax.random.PRNGKey(0)

    # ------------------------------------------------------------------ #
    # 1) Small shapes consistent with SimpleNet(d_in, d_out): fast path.  #
    # ------------------------------------------------------------------ #
    B, d_in, d_out = 8, 32, 32
    kx, kw, kb = jax.random.split(key, 3)
    x = jax.random.normal(kx, (B, d_in), dtype=jnp.float32)
    bound = 1.0 / (d_in ** 0.5)  # mimic nn.Linear init
    weight = jax.random.uniform(kw, (d_out, d_in), jnp.float32, -bound, bound)
    bias = jax.random.uniform(kb, (d_out,), jnp.float32, -bound, bound)

    wt_p, b_p = prepare_linear_params(weight, bias, use_bf16=True)
    out = jax.block_until_ready(simple_net_forward(x, wt_p, b_p, d_out=d_out))
    assert out.shape == (B, d_out)

    x_r = x.astype(jnp.bfloat16).astype(jnp.float32)
    w_r = weight.astype(jnp.bfloat16).astype(jnp.float32)
    ref = jnp.maximum(x_r @ w_r.T + bias, 0.0)
    assert jnp.allclose(out, ref, atol=2e-2, rtol=2e-2), (
        float(jnp.max(jnp.abs(out - ref))))

    # Pure-f32 weights, fast path: exact reference.
    wt_f32, b_f32 = prepare_linear_params(weight, bias, use_bf16=False)
    out_f32 = jax.block_until_ready(
        simple_net_forward(x, wt_f32, b_f32, d_out=d_out))
    ref_f32 = jnp.maximum(x @ weight.T + bias, 0.0)
    assert jnp.allclose(out_f32, ref_f32, atol=1e-5, rtol=1e-5)

    # ------------------------------------------------------------------ #
    # 2) Larger shapes: exercise the tiled 3-D-grid path (f32 output,     #
    #    direct accumulation into o_ref) with padding on every axis.      #
    # ------------------------------------------------------------------ #
    B2, d_in2, d_out2 = 160, 384, 512
    kx2, kw2, kb2 = jax.random.split(jax.random.PRNGKey(1), 3)
    x2 = jax.random.normal(kx2, (B2, d_in2), dtype=jnp.float32)
    bound2 = 1.0 / (d_in2 ** 0.5)
    w2 = jax.random.uniform(kw2, (d_out2, d_in2), jnp.float32, -bound2, bound2)
    b2 = jax.random.uniform(kb2, (d_out2,), jnp.float32, -bound2, bound2)

    wt2_p, b2_p = prepare_linear_params(w2, b2, use_bf16=True)
    out2 = jax.block_until_ready(
        simple_net_forward(x2, wt2_p, b2_p, d_out=d_out2,
                           tm=128, tn=256, tk=128, small_fast_path=False))
    assert out2.shape == (B2, d_out2)

    x2_r = x2.astype(jnp.bfloat16).astype(jnp.float32)
    w2_r = w2.astype(jnp.bfloat16).astype(jnp.float32)
    ref2 = jnp.maximum(x2_r @ w2_r.T + b2, 0.0)
    assert jnp.allclose(out2, ref2, atol=2e-2, rtol=2e-2), (
        float(jnp.max(jnp.abs(out2 - ref2))))

    # ------------------------------------------------------------------ #
    # 3) bf16 output dtype: exercises the scratch-accumulator kernel.     #
    # ------------------------------------------------------------------ #
    out3 = jax.block_until_ready(
        simple_net_forward(x2.astype(jnp.bfloat16), wt2_p, b2_p, d_out=d_out2,
                           tm=128, tn=256, tk=128, small_fast_path=False))
    assert out3.dtype == jnp.bfloat16 and out3.shape == (B2, d_out2)
    assert jnp.allclose(out3.astype(jnp.float32), ref2, atol=4e-2, rtol=4e-2), (
        float(jnp.max(jnp.abs(out3.astype(jnp.float32) - ref2))))

    print("KERNEL_OK")
</pallas_src>

<mosaic_0001>
module attributes {stable_mosaic.version = 11 : i64} {
  func.func @_fused_small_kernel(%arg0: i32, %arg1: memref<16x128xbf16, #tpu.memory_space<vmem>>, %arg2: memref<128x128xbf16, #tpu.memory_space<vmem>>, %arg3: memref<1x128xf32, #tpu.memory_space<vmem>>, %arg4: memref<16x128xf32, #tpu.memory_space<vmem>>) attributes {dimension_semantics = [#tpu.dimension_semantics<arbitrary>], iteration_bounds = array<i64: 1>, scalar_prefetch = 0 : i64, scratch_operands = 0 : i64, tpu.core_type = #tpu.core_type<tc>, window_params = [{pipeline_mode = #tpu.pipeline_mode<synchronous>, transform_indices = @transform_0, window_bounds = array<i64: 16, 128>}, {pipeline_mode = #tpu.pipeline_mode<synchronous>, transform_indices = @transform_1, window_bounds = array<i64: 128, 128>}, {pipeline_mode = #tpu.pipeline_mode<synchronous>, transform_indices = @transform_2, window_bounds = array<i64: 1, 128>}, {pipeline_mode = #tpu.pipeline_mode<synchronous>, transform_indices = @transform_3, window_bounds = array<i64: 16, 128>}]} {
    %c0 = arith.constant 0 : index
    %c0_0 = arith.constant 0 : index
    %0 = vector.load %arg1[%c0, %c0_0] : memref<16x128xbf16, #tpu.memory_space<vmem>>, vector<16x128xbf16>
    %c0_1 = arith.constant 0 : index
    %c0_2 = arith.constant 0 : index
    %1 = vector.load %arg2[%c0_1, %c0_2] : memref<128x128xbf16, #tpu.memory_space<vmem>>, vector<128x128xbf16>
    %cst = arith.constant dense<0.000000e+00> : vector<16x128xf32>
    %2 = tpu.matmul %0, %1, %cst {dimension_numbers = #tpu.dot_dimension_numbers<[1], [0], [0], [1], [0, 0, 1, 1], [], []>} : vector<16x128xbf16>, vector<128x128xbf16>, vector<16x128xf32> -> vector<16x128xf32>
    %c0_3 = arith.constant 0 : index
    %c0_4 = arith.constant 0 : index
    %3 = vector.load %arg3[%c0_3, %c0_4] : memref<1x128xf32, #tpu.memory_space<vmem>>, vector<1x128xf32>
    %4 = vector.broadcast %3 : vector<1x128xf32> to vector<16x128xf32>
    %5 = arith.addf %2, %4 : vector<16x128xf32>
    %cst_5 = arith.constant 0.000000e+00 : f32
    %6 = vector.broadcast %cst_5 : f32 to vector<16x128xf32>
    %7 = arith.maximumf %5, %6 : vector<16x128xf32>
    %c0_6 = arith.constant 0 : index
    %c0_7 = arith.constant 0 : index
    %8 = vector.load %arg4[%c0_6, %c0_7] : memref<16x128xf32, #tpu.memory_space<vmem>>, vector<16x128xf32>
    tpu.vector_store %arg4[%c0_6, %c0_7], %7 {strides = array<i32>} : memref<16x128xf32, #tpu.memory_space<vmem>>, vector<16x128xf32>,
    return
  }
  func.func @transform_0(%arg0: i32) -> (i32, i32) {
    %c0_i32 = arith.constant 0 : i32
    %c0_i32_0 = arith.constant 0 : i32
    %c0_i32_1 = arith.constant 0 : i32
    return %c0_i32, %c0_i32_0 : i32, i32
  }
  func.func @transform_1(%arg0: i32) -> (i32, i32) {
    %c0_i32 = arith.constant 0 : i32
    %c0_i32_0 = arith.constant 0 : i32
    %c0_i32_1 = arith.constant 0 : i32
    return %c0_i32, %c0_i32_0 : i32, i32
  }
  func.func @transform_2(%arg0: i32) -> (i32, i32) {
    %c0_i32 = arith.constant 0 : i32
    %c0_i32_0 = arith.constant 0 : i32
    %c0_i32_1 = arith.constant 0 : i32
    return %c0_i32, %c0_i32_0 : i32, i32
  }
  func.func @transform_3(%arg0: i32) -> (i32, i32) {
    %c0_i32 = arith.constant 0 : i32
    %c0_i32_0 = arith.constant 0 : i32
    %c0_i32_1 = arith.constant 0 : i32
    return %c0_i32, %c0_i32_0 : i32, i32
  }
}

</mosaic_0001>

<bundles_post_ra>
// kernel: simple_net_forward.1
= control target key start
LH: loop header
LB: loop body
LE: loop exit
PB: predicated region body
PF: predicated region fallthrough
CT: control target
= control target key end

     0   :  { %8 = vsyncpa [#allocation3], 0  ;;  %s233_s12 = smov [#allocation2]   ;;  %s273_s0 = inlined_call_operand.vmem [shape: bf16[16,128], index: 0, kind: input, shape index: {}]   ;;  %s274_s1 = inlined_call_operand.hbm [shape: bf16[128,128], index: 1, kind: input, shape index: {}]   ;;  %s275_s2 = inlined_call_operand.vmem [shape: f32[1,128], index: 2, kind: input, shape index: {}]   ;;  %s276_s3 = inlined_call_operand.vmem [shape: f32[16,128], index: 3, kind: output, shape index: {}]  }
   0x1   :  { %s16_s13 = sshll.u32 %s233_s12, 4  ;;  %s17_s13 = int_to_ptr.vmem [resolvable:$true] %s16_s13 }
   0x2   :  { %s219_s14 = scalar_lea.vmem %s17_s13, 1024  ;;  %p224_p1 = scmp.lt.s32.totalorder %s17_s13, %s17_s13 }
   0x3   :  { %p220_p0 = scmp.ne.s32.totalorder %s17_s13, %s219_s14  ;;  %p225_p2 = scmp.lt.s32.totalorder %s219_s14, %s219_s14 }
   0x5   :  { %p226_p3 = por %p225_p2, %p224_p1 }
   0x7   :  { %p227_p4 = pnand %p226_p3, %p220_p0 }
   0x9   :  { %230 = shalt.err (!%p227_p4)
}
   0xa   :  { %s234_s15 = smov 64   ;;  %s235_s16 = smov 4  }
   0xb   :  { %22 = dma.hbm_to_vmem [thread:$0]  %s274_s1, 1024, %s17_s13, [#allocation3], %s234_s15, %s234_s15, %s235_s16  }
   0xc   :  { %231 = dma.done.wait [#allocation3], 1024  }
   0xd   :  { %232 = vsyncadd [#allocation3], 4294966272  ;;  %v236_v0 = vmov 0.0   ;;  %vm237_vm0 = vmmov 0   ;;  %v202_v1 = vld [vmem:[#allocation2 + $0x38] sm:$0xff]   ;;  %v203_v2 = vld [vmem:[#allocation2 + $0x30] sm:$0xff]  }
   0xe   :  { %177 = vmatprep.subr.bf16.mxu0 %v236_v0  ;;  %193 = vmatprep.mubr.msk.bf16.mxu0 %vm237_vm0, %v236_v0  ;;  %v204_v3 = vld [vmem:[#allocation2 + $0x28] sm:$0xff]   ;;  %v205_v4 = vld [vmem:[#allocation2 + $0x20] sm:$0xff]   ;;  %v206_v5 = vld [vmem:[#allocation2 + $0x18] sm:$0xff]  }
   0xf   :  { %178 = vmatpush3.bf16.msra.mxu0 %v202_v1  ;;  %v207_v6 = vld [vmem:[#allocation2 + $0x10] sm:$0xff]   ;;  %v208_v7 = vld [vmem:[#allocation2 + $0x8] sm:$0xff]   ;;  %v209_v8 = vld [vmem:[#allocation2] sm:$0xff]  }
  0x10   :  { %179 = vmatprep.subr.bf16.mxu0 %v236_v0  ;;  %v210_v9 = vld [vmem:[%s273_s0] sm:$0xff]  }
  0x11   :  { %v158_v10 = vld [vmem:[%s275_s2] ss:$0 sm:$0xff] }
  0x13   :  { %180 = vmatpush3.bf16.msra.mxu0 %v203_v2 }
  0x14   :  { %181 = vmatprep.subr.bf16.mxu0 %v236_v0 }
  0x17   :  { %182 = vmatpush3.bf16.msra.mxu0 %v204_v3 }
  0x18   :  { %183 = vmatprep.subr.bf16.mxu0 %v236_v0 }
  0x1b   :  { %184 = vmatpush3.bf16.msra.mxu0 %v205_v4 }
  0x1c   :  { %185 = vmatprep.subr.bf16.mxu0 %v236_v0 }
  0x1f   :  { %186 = vmatpush3.bf16.msra.mxu0 %v206_v5 }
  0x20   :  { %187 = vmatprep.subr.bf16.mxu0 %v236_v0 }
  0x23   :  { %188 = vmatpush3.bf16.msra.mxu0 %v207_v6 }
  0x24   :  { %189 = vmatprep.subr.bf16.mxu0 %v236_v0 }
  0x27   :  { %190 = vmatpush3.bf16.msra.mxu0 %v208_v7 }
  0x28   :  { %191 = vmatprep.subr.bf16.mxu0 %v236_v0 }
  0x2b   :  { %192 = vmatpush3.bf16.msra.mxu0 %v209_v8 }
  0x2e   :  { %194 = vmatmul.mubr.bf16.vlgmr.msra.gmra.mxu0 %v210_v9 }
  0xee   :  { %v142_v11 = vpop.f32.mrf.mxu0 }
  0xef   :  { %v143_v12 = vadd.f32 %v158_v10, %v142_v11 }
  0xf0   :  { %v195_v13 = vpop.f32.mrf.mxu0 }
  0xf1   :  { %v149_v14 = vmax.f32 %v143_v12, 0.0 }
  0xf2   :  { %v145_v15 = vpop.f32.mrf.mxu0 }
  0xf3   :  { %151 = vst [vmem:[%s276_s3] sm:$0xff] %v149_v14  ;;  %v146_v16 = vadd.f32 %v158_v10, %v145_v15 }
  0xf4   :  { %v196_v17 = vpop.f32.mrf.mxu0 }
  0xf5   :  { %v150_v18 = vmax.f32 %v146_v16, 0.0 }
  0xf7   :  { %152 = vst [vmem:[%s276_s3 + $0x8] sm:$0xff] %v150_v18 }
  0xf8   :  { %157 = vsyncpa [#allocation3], 1 }

</bundles_post_ra>
